<compile_context>
chip_gen: v7x
topology: tpu7x:2x2x1
jax: 0.10.0
libtpu: 0.0.40
codegen_flags: <defaults>
</compile_context>

<pallas_src>
import functools
import math

import jax
import jax.numpy as jnp
from jax.experimental import pallas as pl
from jax.experimental.pallas import tpu as pltpu


def _round_up(x, m):
    return (x + m - 1) // m * m


def _noisy_linear_kernel(x_ref, wmu_ref, wsig_ref, ein_ref, eout_ref,
                         bmu_ref, bsig_ref, beps_ref, o_ref):
    # x_ref: (tm, tk); wmu/wsig: (tn, tk) in native [out, in] layout;
    # ein: (1, tk); eout: (tn, 1); b*: (1, tn); o_ref: (tm, tn) f32 resident
    # across the k ("arbitrary") grid axis.
    @pl.when(pl.program_id(2) == 0)
    def _():
        bias = bmu_ref[...] + bsig_ref[...] * beps_ref[...]
        o_ref[...] = jnp.broadcast_to(bias.astype(o_ref.dtype), o_ref.shape)

    # Rank-1 noise tile formed on the VPU in VMEM; effective weight never
    # touches HBM.
    w = wmu_ref[...] + wsig_ref[...] * (eout_ref[...] * ein_ref[...])
    # x @ w.T : contract x dim 1 against w dim 1 (weight kept as [out, in]).
    o_ref[...] += jax.lax.dot_general(
        x_ref[...], w,
        dimension_numbers=(((1,), (1,)), ((), ())),
        preferred_element_type=jnp.float32,
    ).astype(o_ref.dtype)


def _linear_kernel(x_ref, wmu_ref, bmu_ref, o_ref):
    # eval / zero-noise path: y = x @ W_mu.T + b_mu
    @pl.when(pl.program_id(2) == 0)
    def _():
        o_ref[...] = jnp.broadcast_to(bmu_ref[...].astype(o_ref.dtype),
                                      o_ref.shape)

    o_ref[...] += jax.lax.dot_general(
        x_ref[...], wmu_ref[...],
        dimension_numbers=(((1,), (1,)), ((), ())),
        preferred_element_type=jnp.float32,
    ).astype(o_ref.dtype)


@functools.partial(
    jax.jit, static_argnames=("training", "zero_noise", "tm", "tn", "tk"))
def noisy_linear(x, w_mu, w_sigma, eps_in, eps_out, b_mu, b_sigma,
                 *, training=True, zero_noise=False,
                 tm=512, tn=256, tk=512):
    """NoisyLinear forward.

    x: [..., in_features]; w_mu/w_sigma: [out, in] (native layout, NOT
    transposed); eps_in: [in]; eps_out: [out]; b_mu/b_sigma: [out].
    weight_epsilon == outer(eps_out, eps_in), bias_epsilon == eps_out, exactly
    as produced by reset_noise().
    tm must be a multiple of 8, tn/tk multiples of 128 (only matters when the
    corresponding dim spans multiple blocks).
    """
    # TODO(synk): an arbitrary (non rank-1) weight_epsilon buffer would need a
    # third streamed weight matrix; reset_noise() only ever produces rank-1.
    orig_shape = x.shape
    K = orig_shape[-1]
    N = w_mu.shape[0]
    M = 1
    for d in orig_shape[:-1]:
        M *= d
    x2 = x.reshape(M, K)

    use_noise = bool(training) and not bool(zero_noise)

    # Full-extent blocks (no padding) when a dim fits in one block; otherwise
    # aligned tiles + pad to a multiple (zero padding is exact for the matmul).
    if M <= tm:
        tm_, Mp = M, M
    else:
        tm_, Mp = tm, _round_up(M, tm)
    if K <= tk:
        tk_, Kp = K, K
    else:
        tk_, Kp = tk, _round_up(K, tk)
    if N <= tn:
        tn_, Np = N, N
    else:
        tn_, Np = tn, _round_up(N, tn)

    # Megacore / v7x: ensure >= 2 parallel blocks when splitting N costs no
    # padding (keeps the second TensorCore busy on single-block problems).
    if (Mp // tm_) * (Np // tn_) == 1 and N >= 256 and N % 256 == 0:
        tn_ = N // 2

    def pad2(a, rows, cols):
        pr, pc = rows - a.shape[0], cols - a.shape[1]
        if pr == 0 and pc == 0:
            return a
        return jnp.pad(a, ((0, pr), (0, pc)))

    xp = pad2(x2, Mp, Kp)
    wmu_p = pad2(w_mu, Np, Kp)                      # stays [out, in]
    bmu_p = pad2(b_mu.reshape(1, N), 1, Np)

    grid = (Mp // tm_, Np // tn_, Kp // tk_)
    x_spec = pl.BlockSpec((tm_, tk_), lambda i, j, k: (i, k))
    w_spec = pl.BlockSpec((tn_, tk_), lambda i, j, k: (j, k))
    b_spec = pl.BlockSpec((1, tn_), lambda i, j, k: (0, j))
    o_spec = pl.BlockSpec((tm_, tn_), lambda i, j, k: (i, j))

    # VMEM budget: double-buffered input/output tiles (f32 upper bound) plus
    # tiny eps/bias rows; no accumulator scratch (accumulate into the resident
    # output block). Cap at 48 MiB so v7x (64 MiB physical) keeps headroom.
    n_w = 2 if use_noise else 1
    tile_bytes = (tm_ * tk_ + n_w * tn_ * tk_ + tm_ * tn_) * 4
    aux_bytes = (tk_ + 4 * tn_) * 4
    vmem_limit = int(min(max(2 * (tile_bytes + aux_bytes) + (4 << 20),
                             16 << 20), 48 << 20))
    compiler_params = pltpu.CompilerParams(
        dimension_semantics=("parallel", "parallel", "arbitrary"),
        vmem_limit_bytes=vmem_limit,
    )

    if use_noise:
        wsig_p = pad2(w_sigma, Np, Kp)
        ein_p = pad2(eps_in.reshape(1, K), 1, Kp)       # (1, Kp) row
        eout_p = pad2(eps_out.reshape(N, 1), Np, 1)     # (Np, 1) column
        bsig_p = pad2(b_sigma.reshape(1, N), 1, Np)
        beps_p = pad2(eps_out.reshape(1, N), 1, Np)     # bias_epsilon == eps_out
        ein_spec = pl.BlockSpec((1, tk_), lambda i, j, k: (0, k))
        eout_spec = pl.BlockSpec((tn_, 1), lambda i, j, k: (j, 0))
        out = pl.pallas_call(
            _noisy_linear_kernel,
            out_shape=jax.ShapeDtypeStruct((Mp, Np), jnp.float32),
            grid_spec=pltpu.PrefetchScalarGridSpec(
                num_scalar_prefetch=0,
                grid=grid,
                in_specs=[x_spec, w_spec, w_spec, ein_spec, eout_spec,
                          b_spec, b_spec, b_spec],
                out_specs=o_spec,
            ),
            compiler_params=compiler_params,
        )(xp, wmu_p, wsig_p, ein_p, eout_p, bmu_p, bsig_p, beps_p)
    else:
        out = pl.pallas_call(
            _linear_kernel,
            out_shape=jax.ShapeDtypeStruct((Mp, Np), jnp.float32),
            grid_spec=pltpu.PrefetchScalarGridSpec(
                num_scalar_prefetch=0,
                grid=grid,
                in_specs=[x_spec, w_spec, b_spec],
                out_specs=o_spec,
            ),
            compiler_params=compiler_params,
        )(xp, wmu_p, bmu_p)

    out = out[:M, :N].astype(x.dtype)
    return out.reshape(orig_shape[:-1] + (N,))


def _reference(x, w_mu, w_sigma, w_eps, b_mu, b_sigma, b_eps,
               training=True, zero_noise=False):
    # Exact f32 reference of the torch forward (HIGHEST precision matmul).
    if training and not zero_noise:
        w = w_mu + w_sigma * w_eps
        b = b_mu + b_sigma * b_eps
    else:
        w, b = w_mu, b_mu
    return jnp.dot(x, w.T, precision=jax.lax.Precision.HIGHEST) + b


def _make_params(key, in_features, out_features, std_init=0.5):
    k_wmu, k_bmu, k_ein, k_eout = jax.random.split(key, 4)
    mu_range = 1.0 / math.sqrt(in_features)
    w_mu = jax.random.uniform(k_wmu, (out_features, in_features),
                              minval=-mu_range, maxval=mu_range,
                              dtype=jnp.float32)
    w_sigma = jnp.full((out_features, in_features),
                       std_init / math.sqrt(in_features), dtype=jnp.float32)
    b_mu = jax.random.uniform(k_bmu, (out_features,),
                              minval=-mu_range, maxval=mu_range,
                              dtype=jnp.float32)
    b_sigma = jnp.full((out_features,),
                       std_init / math.sqrt(out_features), dtype=jnp.float32)

    def scale_noise(k, size):   # matches _scale_noise: sign(x)*sqrt(|x|)
        v = jax.random.normal(k, (size,), dtype=jnp.float32)
        return jnp.sign(v) * jnp.sqrt(jnp.abs(v))

    eps_in = scale_noise(k_ein, in_features)
    eps_out = scale_noise(k_eout, out_features)
    return w_mu, w_sigma, b_mu, b_sigma, eps_in, eps_out


if __name__ == "__main__":
    key = jax.random.PRNGKey(0)
    k1, k2, k3, k4 = jax.random.split(key, 4)

    # Tolerances reflect DEFAULT-precision (bf16 MXU passes, f32 accumulate)
    # vs. the exact f32 reference.
    ATOL = RTOL = 2e-2

    # ---- Case 1: small RL-sized layer, single (unpadded) block -------------
    batch, seq, in_features, out_features = 2, 8, 32, 64
    w_mu, w_sigma, b_mu, b_sigma, eps_in, eps_out = _make_params(
        k1, in_features, out_features)
    w_eps = jnp.outer(eps_out, eps_in)       # only for the reference check
    b_eps = eps_out
    x = jax.random.normal(k2, (batch, seq, in_features), dtype=jnp.float32)

    # training + noise (the characteristic NoisyLinear path)
    out_noisy = noisy_linear(x, w_mu, w_sigma, eps_in, eps_out, b_mu, b_sigma,
                             training=True, zero_noise=False)
    jax.block_until_ready(out_noisy)
    ref_noisy = _reference(x, w_mu, w_sigma, w_eps, b_mu, b_sigma, b_eps,
                           training=True, zero_noise=False)
    assert out_noisy.shape == (batch, seq, out_features)
    assert out_noisy.dtype == x.dtype
    assert jnp.allclose(out_noisy, ref_noisy, atol=ATOL, rtol=RTOL), \
        "noisy path mismatch vs reference"

    # eval path: plain linear with mu parameters
    out_eval = noisy_linear(x, w_mu, w_sigma, eps_in, eps_out, b_mu, b_sigma,
                            training=False, zero_noise=False)
    jax.block_until_ready(out_eval)
    ref_eval = _reference(x, w_mu, w_sigma, w_eps, b_mu, b_sigma, b_eps,
                          training=False, zero_noise=False)
    assert jnp.allclose(out_eval, ref_eval, atol=ATOL, rtol=RTOL), \
        "eval path mismatch vs reference"

    # training + zero_noise(): also plain linear with mu parameters
    out_zero = noisy_linear(x, w_mu, w_sigma, eps_in, eps_out, b_mu, b_sigma,
                            training=True, zero_noise=True)
    jax.block_until_ready(out_zero)
    ref_zero = _reference(x, w_mu, w_sigma, w_eps, b_mu, b_sigma, b_eps,
                          training=True, zero_noise=True)
    assert jnp.allclose(out_zero, ref_zero, atol=ATOL, rtol=RTOL), \
        "zero_noise path mismatch vs reference"

    # ---- Case 2: exercise the multi-block / padded path with small tiles ---
    in2, out2 = 300, 200
    w_mu2, w_sigma2, b_mu2, b_sigma2, eps_in2, eps_out2 = _make_params(
        k3, in2, out2)
    w_eps2 = jnp.outer(eps_out2, eps_in2)
    x2 = jax.random.normal(k4, (16, in2), dtype=jnp.float32)

    out2_noisy = noisy_linear(x2, w_mu2, w_sigma2, eps_in2, eps_out2,
                              b_mu2, b_sigma2, training=True, zero_noise=False,
                              tm=8, tn=128, tk=128)
    jax.block_until_ready(out2_noisy)
    ref2_noisy = _reference(x2, w_mu2, w_sigma2, w_eps2, b_mu2, b_sigma2,
                            eps_out2, training=True, zero_noise=False)
    assert out2_noisy.shape == (16, out2)
    assert jnp.allclose(out2_noisy, ref2_noisy, atol=ATOL, rtol=RTOL), \
        "tiled noisy path mismatch vs reference"

    print("KERNEL_OK")
</pallas_src>

<mosaic_0001>
module attributes {stable_mosaic.version = 11 : i64} {
  func.func @_noisy_linear_kernel(%arg0: i32, %arg1: i32, %arg2: i32, %arg3: memref<16x32xf32, #tpu.memory_space<vmem>>, %arg4: memref<64x32xf32, #tpu.memory_space<vmem>>, %arg5: memref<64x32xf32, #tpu.memory_space<vmem>>, %arg6: memref<1x32xf32, #tpu.memory_space<vmem>>, %arg7: memref<64x1xf32, #tpu.memory_space<vmem>>, %arg8: memref<1x64xf32, #tpu.memory_space<vmem>>, %arg9: memref<1x64xf32, #tpu.memory_space<vmem>>, %arg10: memref<1x64xf32, #tpu.memory_space<vmem>>, %arg11: memref<16x64xf32, #tpu.memory_space<vmem>>) attributes {dimension_semantics = [#tpu.dimension_semantics<parallel>, #tpu.dimension_semantics<parallel>, #tpu.dimension_semantics<arbitrary>], iteration_bounds = array<i64: 1, 1, 1>, scalar_prefetch = 0 : i64, scratch_operands = 0 : i64, tpu.core_type = #tpu.core_type<tc>, window_params = [{transform_indices = @transform_0, window_bounds = array<i64: 16, 32>}, {transform_indices = @transform_1, window_bounds = array<i64: 64, 32>}, {transform_indices = @transform_2, window_bounds = array<i64: 64, 32>}, {transform_indices = @transform_3, window_bounds = array<i64: 1, 32>}, {transform_indices = @transform_4, window_bounds = array<i64: 64, 1>}, {transform_indices = @transform_5, window_bounds = array<i64: 1, 64>}, {transform_indices = @transform_6, window_bounds = array<i64: 1, 64>}, {transform_indices = @transform_7, window_bounds = array<i64: 1, 64>}, {transform_indices = @transform_8, window_bounds = array<i64: 16, 64>}]} {
    %c0_i32 = arith.constant 0 : i32
    %0 = arith.cmpi eq, %arg2, %c0_i32 : i32
    %1 = arith.extui %0 : i1 to i32
    %c0_i32_0 = arith.constant 0 : i32
    %2 = arith.cmpi ne, %1, %c0_i32_0 : i32
    scf.if %2 {
      %c0_14 = arith.constant 0 : index
      %c0_15 = arith.constant 0 : index
      %17 = vector.load %arg8[%c0_14, %c0_15] : memref<1x64xf32, #tpu.memory_space<vmem>>, vector<1x64xf32>
      %c0_16 = arith.constant 0 : index
      %c0_17 = arith.constant 0 : index
      %18 = vector.load %arg9[%c0_16, %c0_17] : memref<1x64xf32, #tpu.memory_space<vmem>>, vector<1x64xf32>
      %c0_18 = arith.constant 0 : index
      %c0_19 = arith.constant 0 : index
      %19 = vector.load %arg10[%c0_18, %c0_19] : memref<1x64xf32, #tpu.memory_space<vmem>>, vector<1x64xf32>
      %20 = arith.mulf %18, %19 : vector<1x64xf32>
      %21 = arith.addf %17, %20 : vector<1x64xf32>
      %22 = vector.shape_cast %21 : vector<1x64xf32> to vector<1x64xf32>
      %23 = vector.broadcast %22 : vector<1x64xf32> to vector<16x64xf32>
      %c0_20 = arith.constant 0 : index
      %c0_21 = arith.constant 0 : index
      %24 = vector.load %arg11[%c0_20, %c0_21] : memref<16x64xf32, #tpu.memory_space<vmem>>, vector<16x64xf32>
      tpu.vector_store %arg11[%c0_20, %c0_21], %23 {strides = array<i32>} : memref<16x64xf32, #tpu.memory_space<vmem>>, vector<16x64xf32>,
    } else {
    }
    %c0 = arith.constant 0 : index
    %c0_1 = arith.constant 0 : index
    %3 = vector.load %arg4[%c0, %c0_1] : memref<64x32xf32, #tpu.memory_space<vmem>>, vector<64x32xf32>
    %c0_2 = arith.constant 0 : index
    %c0_3 = arith.constant 0 : index
    %4 = vector.load %arg5[%c0_2, %c0_3] : memref<64x32xf32, #tpu.memory_space<vmem>>, vector<64x32xf32>
    %c0_4 = arith.constant 0 : index
    %c0_5 = arith.constant 0 : index
    %5 = vector.load %arg7[%c0_4, %c0_5] : memref<64x1xf32, #tpu.memory_space<vmem>>, vector<64x1xf32>
    %c0_6 = arith.constant 0 : index
    %c0_7 = arith.constant 0 : index
    %6 = vector.load %arg6[%c0_6, %c0_7] : memref<1x32xf32, #tpu.memory_space<vmem>>, vector<1x32xf32>
    %7 = vector.broadcast %5 : vector<64x1xf32> to vector<64x32xf32>
    %8 = vector.broadcast %6 : vector<1x32xf32> to vector<64x32xf32>
    %9 = arith.mulf %7, %8 : vector<64x32xf32>
    %10 = arith.mulf %4, %9 : vector<64x32xf32>
    %11 = arith.addf %3, %10 : vector<64x32xf32>
    %c0_8 = arith.constant 0 : index
    %c0_9 = arith.constant 0 : index
    %12 = vector.load %arg11[%c0_8, %c0_9] : memref<16x64xf32, #tpu.memory_space<vmem>>, vector<16x64xf32>
    %c0_10 = arith.constant 0 : index
    %c0_11 = arith.constant 0 : index
    %13 = vector.load %arg3[%c0_10, %c0_11] : memref<16x32xf32, #tpu.memory_space<vmem>>, vector<16x32xf32>
    %cst = arith.constant dense<0.000000e+00> : vector<16x64xf32>
    %14 = tpu.matmul %13, %11, %cst {dimension_numbers = #tpu.dot_dimension_numbers<[1], [1], [0], [0], [0, 0, 1, 0], [], []>} : vector<16x32xf32>, vector<64x32xf32>, vector<16x64xf32> -> vector<16x64xf32>
    %15 = arith.addf %12, %14 : vector<16x64xf32>
    %c0_12 = arith.constant 0 : index
    %c0_13 = arith.constant 0 : index
    %16 = vector.load %arg11[%c0_12, %c0_13] : memref<16x64xf32, #tpu.memory_space<vmem>>, vector<16x64xf32>
    tpu.vector_store %arg11[%c0_12, %c0_13], %15 {strides = array<i32>} : memref<16x64xf32, #tpu.memory_space<vmem>>, vector<16x64xf32>,
    return
  }
  func.func @transform_0(%arg0: i32, %arg1: i32, %arg2: i32) -> (i32, i32) {
    %c0_i32 = arith.constant 0 : i32
    return %arg0, %arg2 : i32, i32
  }
  func.func @transform_1(%arg0: i32, %arg1: i32, %arg2: i32) -> (i32, i32) {
    %c0_i32 = arith.constant 0 : i32
    return %arg1, %arg2 : i32, i32
  }
  func.func @transform_2(%arg0: i32, %arg1: i32, %arg2: i32) -> (i32, i32) {
    %c0_i32 = arith.constant 0 : i32
    return %arg1, %arg2 : i32, i32
  }
  func.func @transform_3(%arg0: i32, %arg1: i32, %arg2: i32) -> (i32, i32) {
    %c0_i32 = arith.constant 0 : i32
    %c0_i32_0 = arith.constant 0 : i32
    return %c0_i32, %arg2 : i32, i32
  }
  func.func @transform_4(%arg0: i32, %arg1: i32, %arg2: i32) -> (i32, i32) {
    %c0_i32 = arith.constant 0 : i32
    %c0_i32_0 = arith.constant 0 : i32
    return %arg1, %c0_i32 : i32, i32
  }
  func.func @transform_5(%arg0: i32, %arg1: i32, %arg2: i32) -> (i32, i32) {
    %c0_i32 = arith.constant 0 : i32
    %c0_i32_0 = arith.constant 0 : i32
    return %c0_i32, %arg1 : i32, i32
  }
  func.func @transform_6(%arg0: i32, %arg1: i32, %arg2: i32) -> (i32, i32) {
    %c0_i32 = arith.constant 0 : i32
    %c0_i32_0 = arith.constant 0 : i32
    return %c0_i32, %arg1 : i32, i32
  }
  func.func @transform_7(%arg0: i32, %arg1: i32, %arg2: i32) -> (i32, i32) {
    %c0_i32 = arith.constant 0 : i32
    %c0_i32_0 = arith.constant 0 : i32
    return %c0_i32, %arg1 : i32, i32
  }
  func.func @transform_8(%arg0: i32, %arg1: i32, %arg2: i32) -> (i32, i32) {
    %c0_i32 = arith.constant 0 : i32
    return %arg0, %arg1 : i32, i32
  }
}

</mosaic_0001>

<bundles_post_ra>
// kernel: noisy_linear.1
= control target key start
LH: loop header
LB: loop body
LE: loop exit
PB: predicated region body
PF: predicated region fallthrough
CT: control target
= control target key end

     0   :  { %v368_v2 = vmov 0   ;;  %s547_s0 = inlined_call_operand.vmem [shape: f32[16,32], index: 0, kind: input, shape index: {}]   ;;  %s548_s1 = inlined_call_operand.vmem [shape: f32[64,32], index: 1, kind: input, shape index: {}]   ;;  %s549_s2 = inlined_call_operand.vmem [shape: f32[64,32], index: 2, kind: input, shape index: {}]   ;;  %s550_s3 = inlined_call_operand.vmem [shape: f32[1,32], index: 3, kind: input, shape index: {}]   ;;  %s551_s4 = inlined_call_operand.vmem [shape: f32[64,1], index: 4, kind: input, shape index: {}]   ;;  %s552_s5 = inlined_call_operand.vmem [shape: f32[1,64], index: 5, kind: input, shape index: {}]   ;;  %s553_s6 = inlined_call_operand.vmem [shape: f32[1,64], index: 6, kind: input, shape index: {}]   ;;  %s554_s7 = inlined_call_operand.vmem [shape: f32[1,64], index: 7, kind: input, shape index: {}]   ;;  %s555_s8 = inlined_call_operand.hbm [shape: f32[16,64], index: 8, kind: output, shape index: {}]  }
   0x1   :  { %v66_v0 = vld [vmem:[%s551_s4 + $0x10] sm:$0xff]  ;;  %v64_v1 = vld [vmem:[%s551_s4] sm:$0xff]  ;;  %343 = vset.pattern.permute.xlu1 %v368_v2  ;;  %342 = vset.pattern.permute.xlu0 %v368_v2  ;;  %v67_v3 = vld [vmem:[%s551_s4 + $0x18] sm:$0xff] }
   0x2   :  { %85 = vperm.xlu1 %343, %v66_v0   ;;  %75 = vperm.xlu0 %342, %v64_v1   ;;  %v65_v4 = vld [vmem:[%s551_s4 + $0x8] sm:$0xff] }
   0x3   :  { %13 = vsyncpa [#allocation3], 0  ;;  %v69_v5 = vld [vmem:[%s551_s4 + $0x28] sm:$0xff]  ;;  %v68_v6 = vld [vmem:[%s551_s4 + $0x20] sm:$0xff]  ;;  %vm147_vm0 = vcmask 261120   ;;  %v40_v13 = vlaneseq  ;;  %vm45_vm1 = vcmask 523264  }
   0x4   :  { %v71_v7 = vld [vmem:[%s551_s4 + $0x38] sm:$0xff]  ;;  %v70_v8 = vld [vmem:[%s551_s4 + $0x30] sm:$0xff]  ;;  %v145_v9 = vld [vmem:[%s547_s0] sm:$0xff]  ;;  %s369_s10 = smov [#allocation2]  }
   0x5   :  { %311 = vmatprep.mubr.msk.f32.mxu0 %vm147_vm0, %v145_v9  ;;  %v34_v10 = vld [vmem:[%s552_s5] sm:$0x1]  ;;  %v41_v15 = vshrl.u32 %v40_v13, 7  ;;  %v58_v21 = vld [vmem:[%s549_s2 + $0x10] sm:$0xff]  ;;  %v59_v30 = vld [vmem:[%s549_s2 + $0x18] sm:$0xff] }
   0x6   :  { %90 = vperm.xlu1 %343, %v67_v3   ;;  %80 = vperm.xlu0 %342, %v65_v4   ;;  %v35_v11 = vld [vmem:[%s553_s6] sm:$0x1]  ;;  %v50_v27 = vld [vmem:[%s548_s1 + $0x10] sm:$0xff]  ;;  %v57_v32 = vld [vmem:[%s549_s2 + $0x8] sm:$0xff] }
   0x7   :  { %v36_v12 = vld [vmem:[%s554_s7] sm:$0x1]  ;;  %v42_v17 = vsub.s32 0, %v41_v15  ;;  %v51_v36 = vld [vmem:[%s548_s1 + $0x18] sm:$0xff]  ;;  %v49_v37 = vld [vmem:[%s548_s1 + $0x8] sm:$0xff] }
   0x8   :  { %v37_v14 = vmul.f32 %v36_v12, %v35_v11  ;;  %v274_v19 = vld [vmem:[%s550_s3] ss:$0 sm:$0xff]  ;;  %v61_v48 = vld [vmem:[%s549_s2 + $0x28] sm:$0xff]  ;;  %vm491_vm2 = vmpackc.low %vm147_vm0, %vm147_vm0  ;;  %s263_s3 = sshll.u32 %s369_s10, 4  ;;  %s264_s3 = int_to_ptr.vmem [resolvable:$true] %s263_s3 }
   0x9   :  { %v56_v24 = vld [vmem:[%s549_s2] sm:$0xff]  ;;  %v53_v55 = vld [vmem:[%s548_s1 + $0x28] sm:$0xff]  ;;  %v63_v63 = vld [vmem:[%s549_s2 + $0x38] sm:$0xff]  ;;  %s344_s11 = scalar_lea.vmem %s264_s3, 256  ;;  %p349_p1 = scmp.lt.s32.totalorder %s264_s3, %s264_s3 }
   0xa   :  { %100 = vperm.xlu1 %343, %v69_v5   ;;  %95 = vperm.xlu0 %342, %v68_v6   ;;  %v38_v16 = vadd.f32 %v37_v14, %v34_v10  ;;  %v48_v35 = vld [vmem:[%s548_s1] sm:$0xff]  ;;  %v62_v0 = vld [vmem:[%s549_s2 + $0x30] sm:$0xff]  ;;  %v55_v4 = vld [vmem:[%s548_s1 + $0x38] sm:$0xff]  ;;  %p345_p0 = scmp.ne.s32.totalorder %s264_s3, %s344_s11  ;;  %p350_p2 = scmp.lt.s32.totalorder %s344_s11, %s344_s11 }
   0xb   :  { %v60_v49 = vld [vmem:[%s549_s2 + $0x20] sm:$0xff]  ;;  %v54_v5 = vld [vmem:[%s548_s1 + $0x30] sm:$0xff]  ;;  %v146_v9 = vld [vmem:[%s547_s0 + $0x8] sm:$0xff] }
   0xc   :  { %v43_v18 = vrot.slane %v38_v16, %v42_v17  ;;  %v52_v56 = vld [vmem:[%s548_s1 + $0x20] sm:$0xff]  ;;  %p351_p3 = por %p350_p2, %p349_p1 }
   0xe   :  { %110 = vperm.xlu1 %343, %v71_v7   ;;  %105 = vperm.xlu0 %342, %v70_v8   ;;  %47 = vst.msk [vmem:[#allocation2 + $0x8] sm:$0xff] %vm45_vm1, %v43_v18  ;;  %46 = vst.msk [vmem:[#allocation2] sm:$0xff] %vm45_vm1, %v43_v18  ;;  %p352_p4 = pnand %p351_p3, %p345_p0 }
  0x15   :  { %v144_v10 = vld [vmem:[#allocation2 + $0x8] sm:$0xff]  ;;  %v143_v11 = vld [vmem:[#allocation2] sm:$0xff] }
  0x81   :  { %v86_v20 = vpop.permute.xlu1 %85  ;;  %v76_v22 = vpop.permute.xlu0 %75 }
  0x82   :  { %v121_v23 = vmul.f32 %v274_v19, %v86_v20  ;;  %v119_v25 = vmul.f32 %v274_v19, %v76_v22 }
  0x84   :  { %v129_v26 = vmul.f32 %v121_v23, %v58_v21  ;;  %v127_v28 = vmul.f32 %v119_v25, %v56_v24 }
  0x85   :  { %v91_v29 = vpop.permute.xlu1 %90  ;;  %v81_v31 = vpop.permute.xlu0 %80 }
  0x86   :  { %v122_v33 = vmul.f32 %v274_v19, %v91_v29  ;;  %v120_v34 = vmul.f32 %v274_v19, %v81_v31  ;;  %v137_v38 = vadd.f32 %v129_v26, %v50_v27  ;;  %v135_v43 = vadd.f32 %v127_v28, %v48_v35 }
  0x88   :  { %v130_v39 = vmul.f32 %v122_v33, %v59_v30  ;;  %v128_v40 = vmul.f32 %v120_v34, %v57_v32 }
  0x89   :  { %v101_v41 = vpop.permute.xlu1 %100  ;;  %v96_v42 = vpop.permute.xlu0 %95 }
  0x8a   :  { %v138_v44 = vadd.f32 %v130_v39, %v51_v36  ;;  %v124_v45 = vmul.f32 %v274_v19, %v101_v41  ;;  %v123_v46 = vmul.f32 %v274_v19, %v96_v42  ;;  %v136_v47 = vadd.f32 %v128_v40, %v49_v37 }
  0x8c   :  { %v320_v51 = vpack.c.bf16 %v138_v44, %v137_v38  ;;  %v314_v52 = vpack.c.bf16 %v136_v47, %v135_v43  ;;  %v132_v53 = vmul.f32 %v124_v45, %v61_v48  ;;  %v131_v54 = vmul.f32 %v123_v46, %v60_v49 }
  0x8d   :  { %v111_v57 = vpop.permute.xlu1 %110  ;;  %v106_v58 = vpop.permute.xlu0 %105 }
  0x8e   :  { %316 = vmatprep.subr.msk.bf16.mxu0 %vm491_vm2, %v314_v52  ;;  %v140_v59 = vadd.f32 %v132_v53, %v53_v55  ;;  %v139_v60 = vadd.f32 %v131_v54, %v52_v56  ;;  %v126_v61 = vmul.f32 %v274_v19, %v111_v57  ;;  %v125_v62 = vmul.f32 %v274_v19, %v106_v58 }
  0x8f   :  { %319 = vmatpush3.bf16.xpose.msk.msra.mxu0 %vm491_vm2, %v314_v52 }
  0x90   :  { %322 = vmatprep.subr.msk.bf16.mxu0 %vm491_vm2, %v320_v51  ;;  %v326_v1 = vpack.c.bf16 %v140_v59, %v139_v60  ;;  %v134_v2 = vmul.f32 %v126_v61, %v63_v63  ;;  %v133_v3 = vmul.f32 %v125_v62, %v62_v0 }
  0x92   :  { %v142_v6 = vadd.f32 %v134_v2, %v55_v4  ;;  %v141_v7 = vadd.f32 %v133_v3, %v54_v5 }
  0x94   :  { %v332_v8 = vpack.c.bf16 %v142_v6, %v141_v7 }
  0x97   :  { %325 = vmatpush3.bf16.xpose.msk.msra.mxu0 %vm491_vm2, %v320_v51 }
  0x98   :  { %328 = vmatprep.subr.msk.bf16.mxu0 %vm491_vm2, %v326_v1 }
  0x9f   :  { %331 = vmatpush3.bf16.xpose.msk.msra.mxu0 %vm491_vm2, %v326_v1 }
  0xa0   :  { %334 = vmatprep.subr.msk.bf16.mxu0 %vm491_vm2, %v332_v8 }
  0xa7   :  { %337 = vmatpush3.bf16.xpose.msk.msra.mxu0 %vm491_vm2, %v332_v8 }
  0xae   :  { %312 = vmatmul.mubr.msk.f32.vlgmr.msra.gmra.mrb[0].mxu0 %vm147_vm0, %v146_v9 }
 0x181   :  { %v313_v12 = vpop.f32.mrb[0].mxu0 }
 0x182   :  { %v254_v13 = vadd.f32 %v313_v12, %v144_v10  ;;  %v244_v14 = vpop.f32.mrb[1].mxu0 }
 0x183   :  { %v253_v15 = vadd.f32 %v244_v14, %v143_v11 }
 0x184   :  { %257 = vst.msk [vmem:[#allocation2 + $0x8] sm:$0xff] %vm45_vm1, %v254_v13 }
 0x185   :  { %256 = vst.msk [vmem:[#allocation2] sm:$0xff] %vm45_vm1, %v253_v15 }
 0x186   :  { %355 = shalt.err (!%p352_p4)
}
 0x187   :  { %s356_s13 = scalar_lea.hbm %s555_s8, 256 }
 0x188   :  { %p357_p5 = scmp.ne.s32.totalorder %s555_s8, %s356_s13  ;;  %p360_p6 = scmp.lt.u32.totalorder %s356_s13, %s555_s8 }
 0x18a   :  { %p362_p7 = pnand %p360_p6, %p357_p5 }
 0x18c   :  { %365 = shalt.err (!%p362_p7)
}
 0x18d   :  { %s370_s18 = smov 128   ;;  %s371_s19 = smov 8  }
 0x18e   :  { %269 = dma.vmem_to_hbm [thread:$0]  %s264_s3, 256, %s555_s8, [#allocation3], %s370_s18, %s370_s18, %s371_s19  }
 0x18f   :  { %366 = dma.done.wait [#allocation3], 256  }
 0x190   :  { %367 = vsyncadd [#allocation3], 4294967040 }
 0x191   :  { %273 = vsyncpa [#allocation3], 1 }

</bundles_post_ra>
